<compile_context>
chip_gen: v6e
topology: v6e:2x2x1
jax: 0.10.0
libtpu: 0.0.40
codegen_flags: <defaults>
</compile_context>

<pallas_src>
import functools

import jax
import jax.numpy as jnp
from jax.experimental import pallas as pl
from jax.experimental.pallas import tpu as pltpu

LANES = 128


def _round_up(n, m):
    return (n + m - 1) // m * m


def decoder_kernel(x_ref, w2_ref, b2_ref, w3_ref, b3_ref, out_ref, *,
                   out_valid, approx):
    # NOTE: linear1's output is dead in the reference forward (overwritten
    # before use), so it is intentionally not computed here.
    x = x_ref[...]                                            # [TB, in_dim]

    # h = relu(x @ W2 + b2): MXU-dtype operands, f32 accumulation + f32
    # elementwise (important on v5e: no bf16 VPU/EUP).
    h = jnp.dot(x, w2_ref[...], preferred_element_type=jnp.float32) + b2_ref[...]
    h = jnp.maximum(h, 0.0)                                   # [TB, in_dim] f32

    # logits = h @ W3 + b3 on the lane-dense padded slab [TB, OUT_PAD].
    logits = (
        jnp.dot(h.astype(w3_ref.dtype), w3_ref[...],
                preferred_element_type=jnp.float32)
        + b3_ref[...]
    )

    # Softmax over the last dim (== PyTorch dim=1 of the [B, out] result).
    # Padded columns carry a -1e30 bias, so exp(...) == 0 and they never
    # perturb max/sum.
    m = jnp.max(logits, axis=-1, keepdims=True)
    e = jnp.exp(logits - m)
    denom = jnp.sum(e, axis=-1, keepdims=True)
    if approx:
        probs = e * pl.reciprocal(denom, approx=True)   # EUP slot; ~1e-3 error
    else:
        probs = e / denom                               # exact: rows sum to 1

    # Store only the valid columns -> unpadded HBM writeback (8x fewer bytes
    # than a 128-lane f32 slab at output_size=16).
    out_ref[...] = probs[:, :out_valid].astype(out_ref.dtype)


def decoder_forward(x, params, *, block_b=1024, compute_dtype=jnp.bfloat16,
                    out_dtype=jnp.float32, approx_reciprocal=False):
    """x: [B, in_dim] float32. params: dict of PyTorch-shaped weights."""
    B, in_dim = x.shape
    output_size = params["w3"].shape[0]

    out_pad = _round_up(max(output_size, LANES), LANES)   # lane-dense compute slab
    itemsize = jnp.dtype(compute_dtype).itemsize
    out_itemsize = jnp.dtype(out_dtype).itemsize
    # bf16 packs two rows per sublane -> batch tiles in multiples of 16 (8 f32).
    min_tile = 16 if itemsize == 2 else 8

    # ---- VMEM budget --------------------------------------------------------
    try:
        vmem_cap = int(pltpu.get_tpu_info().vmem_capacity_bytes)
    except Exception:
        vmem_cap = 64 << 20               # v7x-safe assumption if query fails
    vmem_ceiling = int(0.8 * vmem_cap)    # leave headroom for compiler scratch

    # Resident weights/biases; assume worst case (Pallas double-buffers inputs).
    # TODO(synk): single-buffer resident weights (pipeline_mode=pl.Buffered(1))
    # and add a K grid axis once in_dim grows enough for 2x residency to matter.
    resident_bytes = 2 * ((in_dim * in_dim + in_dim * out_pad) * itemsize
                          + (in_dim + out_pad) * 4)
    # Per-batch-row footprint: double-buffered x/out tiles + f32 logit slab.
    per_row = 2 * (in_dim * itemsize + output_size * out_itemsize) + out_pad * 4

    budget = max(vmem_ceiling - resident_bytes, min_tile * per_row)
    tb_budget = max(min_tile, (budget // per_row) // min_tile * min_tile)

    # Batch tile: as large as block_b / B / VMEM budget allow ...
    tb = min(block_b, _round_up(B, min_tile), tb_budget)
    # ... but keep >= 2 grid steps whenever the batch allows it (v7x: the two
    # TensorCores share the "parallel" axis; a 1-step grid idles half the chip).
    half = _round_up(pl.cdiv(B, 2), min_tile)
    if _round_up(B, min_tile) >= 2 * min_tile and tb > half:
        tb = half
    b_pad = _round_up(B, tb)
    grid = (b_pad // tb,)

    # ---- wrapper-side glue (layout only) ------------------------------------
    x_p = x if b_pad == B else jnp.pad(x, ((0, b_pad - B), (0, 0)))
    x_p = x_p.astype(compute_dtype)

    w2_t = params["w2"].T.astype(compute_dtype)             # [in, in]
    b2 = params["b2"].reshape(1, -1).astype(jnp.float32)    # [1, in]
    w3_t = params["w3"].T.astype(compute_dtype)             # [in, out]
    b3 = params["b3"].reshape(1, -1).astype(jnp.float32)    # [1, out]
    if out_pad != output_size:
        w3_t = jnp.pad(w3_t, ((0, 0), (0, out_pad - output_size)))
        # Huge negative bias on padded logit columns -> exp() == 0 in softmax.
        b3 = jnp.pad(b3, ((0, 0), (0, out_pad - output_size)),
                     constant_values=-1e30)

    # Weights/biases: constant block index -> DMA'd once, stay VMEM-resident.
    resident = lambda shape: pl.BlockSpec(shape, lambda i: (0, 0))

    # Advisory cost estimate (output bytes reflect the unpadded writeback).
    flops = 2 * b_pad * in_dim * in_dim + 2 * b_pad * in_dim * out_pad
    transcendentals = b_pad * out_pad
    bytes_accessed = int(
        x_p.size * x_p.dtype.itemsize
        + (w2_t.size + w3_t.size) * itemsize
        + (b2.size + b3.size) * 4
        + b_pad * output_size * out_itemsize
    )

    vmem_need = (
        resident_bytes // 2
        + 2 * (tb * in_dim * itemsize + tb * output_size * out_itemsize)
        + tb * out_pad * 4
    )
    vmem_limit = int(min(max(2 * vmem_need, 32 << 20), vmem_ceiling))

    kernel = functools.partial(decoder_kernel, out_valid=output_size,
                               approx=approx_reciprocal)

    out_padded = pl.pallas_call(
        kernel,
        out_shape=jax.ShapeDtypeStruct((b_pad, output_size), out_dtype),
        grid_spec=pltpu.PrefetchScalarGridSpec(
            num_scalar_prefetch=0,
            grid=grid,
            in_specs=[
                pl.BlockSpec((tb, in_dim), lambda i: (i, 0)),   # x: batch-tiled
                resident(w2_t.shape),
                resident(b2.shape),
                resident(w3_t.shape),
                resident(b3.shape),
            ],
            out_specs=pl.BlockSpec((tb, output_size), lambda i: (i, 0)),
        ),
        compiler_params=pltpu.CompilerParams(
            dimension_semantics=("parallel",),      # shard batch over TCs
            vmem_limit_bytes=vmem_limit,
        ),
        cost_estimate=pl.CostEstimate(
            flops=flops,
            transcendentals=transcendentals,
            bytes_accessed=bytes_accessed,
        ),
    )(x_p, w2_t, b2, w3_t, b3)

    return out_padded[:B]


def init_params(key, in_dim, output_size):
    """Deterministic init mimicking nn.Linear shapes: W [out, in], b [out]."""
    ks = jax.random.split(key, 6)

    def lin(kw, kb, fan_in, fan_out):
        bound = 1.0 / jnp.sqrt(fan_in)
        w = jax.random.uniform(kw, (fan_out, fan_in), jnp.float32, -bound, bound)
        b = jax.random.uniform(kb, (fan_out,), jnp.float32, -bound, bound)
        return w, b

    w1, b1 = lin(ks[0], ks[1], in_dim, in_dim)  # unused in forward (dead branch)
    w2, b2 = lin(ks[2], ks[3], in_dim, in_dim)
    w3, b3 = lin(ks[4], ks[5], in_dim, output_size)
    return {"w1": w1, "b1": b1, "w2": w2, "b2": b2, "w3": w3, "b3": b3}


if __name__ == "__main__":
    key = jax.random.PRNGKey(0)
    k_x, k_p = jax.random.split(key)

    # B=256 exercises the batch grid (2 parallel steps of TB=128) while
    # in_dim/output_size stay modest.
    B, in_dim, output_size = 256, 32, 16
    x = jax.random.normal(k_x, (B, in_dim), jnp.float32)
    params = init_params(k_p, in_dim, output_size)

    # Pure-JAX float32 reference of the PyTorch forward semantics.
    h_ref = jnp.maximum(x @ params["w2"].T + params["b2"], 0.0)
    logits_ref = h_ref @ params["w3"].T + params["b3"]
    ref = jax.nn.softmax(logits_ref, axis=1)

    # 1) Exact path (f32 operands): tight numerical check.
    out_f32 = decoder_forward(x, params, compute_dtype=jnp.float32)
    out_f32 = jax.block_until_ready(out_f32)
    assert out_f32.shape == (B, output_size)
    assert jnp.allclose(out_f32, ref, atol=1e-5, rtol=1e-5)
    assert jnp.allclose(jnp.sum(out_f32, axis=1), 1.0, atol=1e-5)

    # 2) Default perf path (bf16 MXU operands, exact f32 normalization).
    out_perf = decoder_forward(x, params)
    out_perf = jax.block_until_ready(out_perf)
    assert out_perf.shape == (B, output_size)
    assert jnp.allclose(out_perf, ref, atol=3e-2)
    assert jnp.allclose(jnp.sum(out_perf, axis=1), 1.0, atol=1e-4)

    print("KERNEL_OK")
</pallas_src>

<mosaic_0001>
module attributes {stable_mosaic.version = 11 : i64} {
  func.func @decoder_kernel(%arg0: i32, %arg1: memref<128x32xf32, #tpu.memory_space<vmem>>, %arg2: memref<32x32xf32, #tpu.memory_space<vmem>>, %arg3: memref<1x32xf32, #tpu.memory_space<vmem>>, %arg4: memref<32x128xf32, #tpu.memory_space<vmem>>, %arg5: memref<1x128xf32, #tpu.memory_space<vmem>>, %arg6: memref<128x16xf32, #tpu.memory_space<vmem>>) attributes {dimension_semantics = [#tpu.dimension_semantics<parallel>], iteration_bounds = array<i64: 2>, scalar_prefetch = 0 : i64, scratch_operands = 0 : i64, tpu.core_type = #tpu.core_type<tc>, window_params = [{transform_indices = @transform_0, window_bounds = array<i64: 128, 32>}, {pipeline_mode = #tpu.pipeline_mode<synchronous>, transform_indices = @transform_1, window_bounds = array<i64: 32, 32>}, {pipeline_mode = #tpu.pipeline_mode<synchronous>, transform_indices = @transform_2, window_bounds = array<i64: 1, 32>}, {pipeline_mode = #tpu.pipeline_mode<synchronous>, transform_indices = @transform_3, window_bounds = array<i64: 32, 128>}, {pipeline_mode = #tpu.pipeline_mode<synchronous>, transform_indices = @transform_4, window_bounds = array<i64: 1, 128>}, {transform_indices = @transform_5, window_bounds = array<i64: 128, 16>}]} {
    %c0 = arith.constant 0 : index
    %c0_0 = arith.constant 0 : index
    %0 = vector.load %arg1[%c0, %c0_0] : memref<128x32xf32, #tpu.memory_space<vmem>>, vector<128x32xf32>
    %c0_1 = arith.constant 0 : index
    %c0_2 = arith.constant 0 : index
    %1 = vector.load %arg2[%c0_1, %c0_2] : memref<32x32xf32, #tpu.memory_space<vmem>>, vector<32x32xf32>
    %cst = arith.constant dense<0.000000e+00> : vector<128x32xf32>
    %2 = tpu.matmul %0, %1, %cst {dimension_numbers = #tpu.dot_dimension_numbers<[1], [0], [0], [1], [0, 0, 1, 1], [], []>} : vector<128x32xf32>, vector<32x32xf32>, vector<128x32xf32> -> vector<128x32xf32>
    %c0_3 = arith.constant 0 : index
    %c0_4 = arith.constant 0 : index
    %3 = vector.load %arg3[%c0_3, %c0_4] : memref<1x32xf32, #tpu.memory_space<vmem>>, vector<1x32xf32>
    %4 = vector.broadcast %3 : vector<1x32xf32> to vector<128x32xf32>
    %5 = arith.addf %2, %4 : vector<128x32xf32>
    %cst_5 = arith.constant 0.000000e+00 : f32
    %6 = vector.broadcast %cst_5 : f32 to vector<128x32xf32>
    %7 = arith.maximumf %5, %6 : vector<128x32xf32>
    %c0_6 = arith.constant 0 : index
    %c0_7 = arith.constant 0 : index
    %8 = vector.load %arg4[%c0_6, %c0_7] : memref<32x128xf32, #tpu.memory_space<vmem>>, vector<32x128xf32>
    %cst_8 = arith.constant dense<0.000000e+00> : vector<128x128xf32>
    %9 = tpu.matmul %7, %8, %cst_8 {dimension_numbers = #tpu.dot_dimension_numbers<[1], [0], [0], [1], [0, 0, 1, 1], [], []>} : vector<128x32xf32>, vector<32x128xf32>, vector<128x128xf32> -> vector<128x128xf32>
    %c0_9 = arith.constant 0 : index
    %c0_10 = arith.constant 0 : index
    %10 = vector.load %arg5[%c0_9, %c0_10] : memref<1x128xf32, #tpu.memory_space<vmem>>, vector<1x128xf32>
    %11 = vector.broadcast %10 : vector<1x128xf32> to vector<128x128xf32>
    %12 = arith.addf %9, %11 : vector<128x128xf32>
    %cst_11 = arith.constant dense<0xFF800000> : vector<128xf32>
    %13 = vector.multi_reduction <maximumf>, %12, %cst_11 [1] : vector<128x128xf32> to vector<128xf32>
    %14 = vector.shape_cast %13 : vector<128xf32> to vector<128x1xf32>
    %15 = vector.broadcast %14 : vector<128x1xf32> to vector<128x128xf32>
    %16 = arith.subf %12, %15 : vector<128x128xf32>
    %17 = math.exp %16 : vector<128x128xf32>
    %cst_12 = arith.constant dense<0.000000e+00> : vector<128xf32>
    %18 = vector.multi_reduction <add>, %17, %cst_12 [1] : vector<128x128xf32> to vector<128xf32>
    %19 = vector.shape_cast %18 : vector<128xf32> to vector<128x1xf32>
    %20 = vector.broadcast %19 : vector<128x1xf32> to vector<128x128xf32>
    %21 = arith.divf %17, %20 : vector<128x128xf32>
    %22 = vector.extract_strided_slice %21 {offsets = [0, 0], sizes = [128, 16], strides = [1, 1]} : vector<128x128xf32> to vector<128x16xf32>
    %c0_13 = arith.constant 0 : index
    %c0_14 = arith.constant 0 : index
    %23 = vector.load %arg6[%c0_13, %c0_14] : memref<128x16xf32, #tpu.memory_space<vmem>>, vector<128x16xf32>
    tpu.vector_store %arg6[%c0_13, %c0_14], %22 {strides = array<i32>} : memref<128x16xf32, #tpu.memory_space<vmem>>, vector<128x16xf32>,
    return
  }
  func.func @transform_0(%arg0: i32) -> (i32, i32) {
    %c0_i32 = arith.constant 0 : i32
    %c0_i32_0 = arith.constant 0 : i32
    return %arg0, %c0_i32 : i32, i32
  }
  func.func @transform_1(%arg0: i32) -> (i32, i32) {
    %c0_i32 = arith.constant 0 : i32
    %c0_i32_0 = arith.constant 0 : i32
    %c0_i32_1 = arith.constant 0 : i32
    return %c0_i32, %c0_i32_0 : i32, i32
  }
  func.func @transform_2(%arg0: i32) -> (i32, i32) {
    %c0_i32 = arith.constant 0 : i32
    %c0_i32_0 = arith.constant 0 : i32
    %c0_i32_1 = arith.constant 0 : i32
    return %c0_i32, %c0_i32_0 : i32, i32
  }
  func.func @transform_3(%arg0: i32) -> (i32, i32) {
    %c0_i32 = arith.constant 0 : i32
    %c0_i32_0 = arith.constant 0 : i32
    %c0_i32_1 = arith.constant 0 : i32
    return %c0_i32, %c0_i32_0 : i32, i32
  }
  func.func @transform_4(%arg0: i32) -> (i32, i32) {
    %c0_i32 = arith.constant 0 : i32
    %c0_i32_0 = arith.constant 0 : i32
    %c0_i32_1 = arith.constant 0 : i32
    return %c0_i32, %c0_i32_0 : i32, i32
  }
  func.func @transform_5(%arg0: i32) -> (i32, i32) {
    %c0_i32 = arith.constant 0 : i32
    %c0_i32_0 = arith.constant 0 : i32
    return %arg0, %c0_i32 : i32, i32
  }
}

</mosaic_0001>

<bundles_post_ra>
// kernel: tpu_custom_call.1
= control target key start
LH: loop header
LB: loop body
LE: loop exit
PB: predicated region body
PF: predicated region fallthrough
CT: control target
= control target key end

     0   :  { %s1145_s18 = smov 0   ;;  %s1371_s0 = inlined_call_operand.vmem [shape: f32[256,32], index: 0, kind: input, shape index: {}]   ;;  %s1372_s1 = inlined_call_operand.vmem [shape: f32[32,32], index: 1, kind: input, shape index: {}]   ;;  %s1373_s2 = inlined_call_operand.vmem [shape: f32[1,32], index: 2, kind: input, shape index: {}]   ;;  %s1374_s3 = inlined_call_operand.vmem [shape: f32[32,128], index: 3, kind: input, shape index: {}]   ;;  %s1375_s4 = inlined_call_operand.vmem [shape: f32[1,128], index: 4, kind: input, shape index: {}]   ;;  %s1376_s5 = inlined_call_operand.vmem [shape: f32[256,16], index: 5, kind: output, shape index: {}]  }
   0x1 LB: > { %s886_s19 = sadd.s32 4294967295, %s1113_s18   ;;  %p890_p0 = scmp.ge.s32.totalorder %s1113_s18, 1  ;;  %s1113_s18 = sphi %s1145_s18, %s15_s18  }
   0x2   : > { %p188_p1 = scmp.lt.s32.totalorder %s1113_s18, 3 }
   0x4   : > { %p189_p2 = pnand %p890_p0, %p188_p1 }
   0x5   : > { %s891_s24 = sshll.u32 (!%p189_p2), %s886_s19, 4 }
   0x6   : > { %192 = sbr.rel (%p189_p2) target bundleno = 759 (0x2f7), region = 40  ;;  %p217_p3 = scmp.lt.s32.totalorder (!%p189_p2), %s891_s24, 31 }
   0xb   : > { %v247_v0 = vld [vmem:[%s1372_s1 + $0x18] sm:$0xff]  ;;  %v246_v1 = vld [vmem:[%s1372_s1 + $0x10] sm:$0xff]  ;;  %v245_v2 = vld [vmem:[%s1372_s1 + $0x8] sm:$0xff]  ;;  %s1378_s24 = smov (!%p217_p3, %s891_s24), 31  ;;  %vm255_vm0 = vcmask 261120   ;;  %vm813_vm1 = vcmask 130048  }
   0xc   : > { %971 = vmatprep.subr.mxu0 %v247_v0  ;;  %v244_v3 = vld [vmem:[%s1372_s1] sm:$0xff]  ;;  %s892_s29 = sshll.u32 %s1378_s24, 3  ;;  %v468_v20 = vld [vmem:[%s1374_s3 + $0x18] sm:$0xff]  ;;  %v467_v21 = vld [vmem:[%s1374_s3 + $0x10] sm:$0xff] }
   0xd   : > { %972 = vmatpush3.msra.mxu0 %v247_v0  ;;  %s1173_s7 = scalar_lea.vmem %s1371_s0, %s892_s29  ;;  %1003 = vmatprep.subr.mxu1 %v468_v20  ;;  %v466_v22 = vld [vmem:[%s1374_s3 + $0x8] sm:$0xff]  ;;  %v465_v23 = vld [vmem:[%s1374_s3] sm:$0xff]  ;;  %s1318_s23 = scalar_lea.vmem %s1376_s5, %s892_s29 }
   0xe   : > { %973 = vmatprep.subr.mxu0 %v246_v1  ;;  %v228_v4 = vld [vmem:[%s1173_s7] sm:$0xff]  ;;  %v229_v5 = vld [vmem:[%s1173_s7 + $0x8] sm:$0xff]  ;;  %v230_v6 = vld [vmem:[%s1173_s7 + $0x10] sm:$0xff]  ;;  %1004 = vmatpush3.msra.mxu1 %v468_v20 }
   0xf   : > { %974 = vmatpush3.msra.mxu0 %v246_v1  ;;  %979 = vmatprep.mubr.msk.f32.mxu0 %vm255_vm0, %v228_v4  ;;  %v231_v7 = vld [vmem:[%s1173_s7 + $0x18] sm:$0xff]  ;;  %v232_v8 = vld [vmem:[%s1173_s7 + $0x20] sm:$0xff]  ;;  %v233_v9 = vld [vmem:[%s1173_s7 + $0x28] sm:$0xff] }
  0x10   : > { %975 = vmatprep.subr.mxu0 %v245_v2  ;;  %v234_v10 = vld [vmem:[%s1173_s7 + $0x30] sm:$0xff]  ;;  %v235_v11 = vld [vmem:[%s1173_s7 + $0x38] sm:$0xff]  ;;  %v236_v12 = vld [vmem:[%s1173_s7 + $0x40] sm:$0xff]  ;;  %1005 = vmatprep.subr.mxu1 %v467_v21 }
  0x11   : > { %976 = vmatpush3.msra.mxu0 %v245_v2  ;;  %v237_v13 = vld [vmem:[%s1173_s7 + $0x48] sm:$0xff]  ;;  %v238_v14 = vld [vmem:[%s1173_s7 + $0x50] sm:$0xff]  ;;  %v239_v15 = vld [vmem:[%s1173_s7 + $0x58] sm:$0xff]  ;;  %1006 = vmatpush3.msra.mxu1 %v467_v21 }
  0x12   : > { %977 = vmatprep.subr.mxu0 %v244_v3  ;;  %v240_v16 = vld [vmem:[%s1173_s7 + $0x60] sm:$0xff]  ;;  %v241_v17 = vld [vmem:[%s1173_s7 + $0x68] sm:$0xff]  ;;  %v242_v18 = vld [vmem:[%s1173_s7 + $0x70] sm:$0xff]  ;;  %1007 = vmatprep.subr.mxu1 %v466_v22 }
  0x13   : > { %978 = vmatpush3.msra.mxu0 %v244_v3  ;;  %v243_v19 = vld [vmem:[%s1173_s7 + $0x78] sm:$0xff]  ;;  %1008 = vmatpush3.msra.mxu1 %v466_v22  ;;  %v895_v24 = vld [vmem:[%s1373_s2] ss:$0 sm:$0xff] }
  0x14   : > { %980 = vmatmul.mubr.msk.f32.vlgmr.msra.gmra.mxu0 %vm255_vm0, %v229_v5  ;;  %1009 = vmatprep.subr.mxu1 %v465_v23 }
  0x15   : > { %982 = vmatprep.mubr.msk.f32.mxu0 %vm255_vm0, %v230_v6  ;;  %1010 = vmatpush3.msra.mxu1 %v465_v23 }
  0x18   : > { %983 = vmatmul.mubr.msk.f32.gmra.mxu0 %vm255_vm0, %v231_v7 }
  0x19   : > { %985 = vmatprep.mubr.msk.f32.mxu0 %vm255_vm0, %v232_v8 }
  0x1c   : > { %986 = vmatmul.mubr.msk.f32.gmra.mxu0 %vm255_vm0, %v233_v9  ;;  %v912_v9 = vld [vmem:[%s1375_s4] ss:$0 sm:$0xff] }
  0x1d   : > { %988 = vmatprep.mubr.msk.f32.mxu0 %vm255_vm0, %v234_v10 }
  0x20   : > { %989 = vmatmul.mubr.msk.f32.gmra.mxu0 %vm255_vm0, %v235_v11 }
  0x21   : > { %991 = vmatprep.mubr.msk.f32.mxu0 %vm255_vm0, %v236_v12 }
  0x24   : > { %992 = vmatmul.mubr.msk.f32.gmra.mxu0 %vm255_vm0, %v237_v13 }
  0x25   : > { %994 = vmatprep.mubr.msk.f32.mxu0 %vm255_vm0, %v238_v14 }
  0x28   : > { %995 = vmatmul.mubr.msk.f32.gmra.mxu0 %vm255_vm0, %v239_v15 }
  0x29   : > { %997 = vmatprep.mubr.msk.f32.mxu0 %vm255_vm0, %v240_v16 }
  0x2c   : > { %998 = vmatmul.mubr.msk.f32.gmra.mxu0 %vm255_vm0, %v241_v17 }
  0x2d   : > { %1000 = vmatprep.mubr.msk.f32.mxu0 %vm255_vm0, %v242_v18 }
  0x30   : > { %1001 = vmatmul.mubr.msk.f32.gmra.mxu0 %vm255_vm0, %v243_v19 }
  0xd4   : > { %v981_v25 = vpop.f32.mrf.mxu0 }
  0xd5   : > { %v376_v26 = vadd.f32 %v981_v25, %v895_v24 }
  0xd6   : > { %v370_v27 = vpop.f32.mrf.mxu0 }
  0xd7   : > { %v371_v28 = vadd.f32 %v895_v24, %v370_v27  ;;  %v450_v31 = vmax.f32 %v376_v26, 0.0 }
  0xd8   : > { %v984_v29 = vpop.f32.mrf.mxu0 }
  0xd9   : > { %v449_v30 = vmax.f32 %v371_v28, 0.0  ;;  %v386_v32 = vadd.f32 %v984_v29, %v895_v24 }
  0xda   : > { %v380_v33 = vpop.f32.mrf.mxu0 }
  0xdb   : > { %v381_v34 = vadd.f32 %v895_v24, %v380_v33  ;;  %1011 = vmatprep.mubr.msk.f32.mxu1 %vm255_vm0, %v449_v30  ;;  %v452_v38 = vmax.f32 %v386_v32, 0.0 }
  0xdc   : > { %v987_v35 = vpop.f32.mrf.mxu0  ;;  %1012 = vmatmul.mubr.msk.f32.vlgmr.msra.gmra.mxu1 %vm255_vm0, %v450_v31 }
  0xdd   : > { %v451_v36 = vmax.f32 %v381_v34, 0.0  ;;  %v396_v37 = vadd.f32 %v987_v35, %v895_v24 }
  0xde   : > { %v390_v39 = vpop.f32.mrf.mxu0 }
  0xdf   : > { %v391_v40 = vadd.f32 %v895_v24, %v390_v39  ;;  %1014 = vmatprep.mubr.msk.f32.mxu1 %vm255_vm0, %v451_v36  ;;  %v454_v41 = vmax.f32 %v396_v37, 0.0 }
  0xe0   : > { %v990_v42 = vpop.f32.mrf.mxu0  ;;  %1015 = vmatmul.mubr.msk.f32.gmra.mxu1 %vm255_vm0, %v452_v38 }
  0xe1   : > { %v453_v43 = vmax.f32 %v391_v40, 0.0  ;;  %v406_v44 = vadd.f32 %v990_v42, %v895_v24 }
  0xe2   : > { %v400_v45 = vpop.f32.mrf.mxu0 }
  0xe3   : > { %v401_v46 = vadd.f32 %v895_v24, %v400_v45  ;;  %1017 = vmatprep.mubr.msk.f32.mxu1 %vm255_vm0, %v453_v43  ;;  %v456_v47 = vmax.f32 %v406_v44, 0.0 }
  0xe4   : > { %v993_v48 = vpop.f32.mrf.mxu0  ;;  %1018 = vmatmul.mubr.msk.f32.gmra.mxu1 %vm255_vm0, %v454_v41 }
  0xe5   : > { %v455_v49 = vmax.f32 %v401_v46, 0.0  ;;  %v416_v50 = vadd.f32 %v993_v48, %v895_v24 }
  0xe6   : > { %v410_v51 = vpop.f32.mrf.mxu0 }
  0xe7   : > { %v411_v52 = vadd.f32 %v895_v24, %v410_v51  ;;  %1020 = vmatprep.mubr.msk.f32.mxu1 %vm255_vm0, %v455_v49  ;;  %v458_v53 = vmax.f32 %v416_v50, 0.0 }
  0xe8   : > { %v996_v54 = vpop.f32.mrf.mxu0  ;;  %1021 = vmatmul.mubr.msk.f32.gmra.mxu1 %vm255_vm0, %v456_v47 }
  0xe9   : > { %v457_v55 = vmax.f32 %v411_v52, 0.0  ;;  %v426_v56 = vadd.f32 %v996_v54, %v895_v24 }
  0xea   : > { %v420_v57 = vpop.f32.mrf.mxu0 }
  0xeb   : > { %v421_v58 = vadd.f32 %v895_v24, %v420_v57  ;;  %1023 = vmatprep.mubr.msk.f32.mxu1 %vm255_vm0, %v457_v55  ;;  %v460_v59 = vmax.f32 %v426_v56, 0.0 }
  0xec   : > { %v999_v60 = vpop.f32.mrf.mxu0  ;;  %1024 = vmatmul.mubr.msk.f32.gmra.mxu1 %vm255_vm0, %v458_v53 }
  0xed   : > { %v459_v61 = vmax.f32 %v421_v58, 0.0  ;;  %v436_v62 = vadd.f32 %v999_v60, %v895_v24 }
  0xee   : > { %v430_v63 = vpop.f32.mrf.mxu0 }
  0xef   : > { %v431_v0 = vadd.f32 %v895_v24, %v430_v63  ;;  %1026 = vmatprep.mubr.msk.f32.mxu1 %vm255_vm0, %v459_v61  ;;  %v462_v1 = vmax.f32 %v436_v62, 0.0 }
  0xf0   : > { %v1002_v2 = vpop.f32.mrf.mxu0  ;;  %1027 = vmatmul.mubr.msk.f32.gmra.mxu1 %vm255_vm0, %v460_v59 }
  0xf1   : > { %v461_v3 = vmax.f32 %v431_v0, 0.0  ;;  %v446_v4 = vadd.f32 %v1002_v2, %v895_v24 }
  0xf2   : > { %v440_v5 = vpop.f32.mrf.mxu0 }
  0xf3   : > { %v441_v6 = vadd.f32 %v895_v24, %v440_v5  ;;  %1029 = vmatprep.mubr.msk.f32.mxu1 %vm255_vm0, %v461_v3  ;;  %v464_v7 = vmax.f32 %v446_v4, 0.0 }
  0xf4   : > { %1030 = vmatmul.mubr.msk.f32.gmra.mxu1 %vm255_vm0, %v462_v1 }
  0xf5   : > { %v463_v8 = vmax.f32 %v441_v6, 0.0 }
  0xf7   : > { %1032 = vmatprep.mubr.msk.f32.mxu1 %vm255_vm0, %v463_v8 }
  0xf8   : > { %1033 = vmatmul.mubr.msk.f32.gmra.mxu1 %vm255_vm0, %v464_v7 }
 0x19c   : > { %v1013_v10 = vpop.f32.mrf.mxu1 }
 0x19d   : > { %v596_v11 = vadd.f32 %v1013_v10, %v912_v9 }
 0x19e   : > { %v590_v12 = vpop.f32.mrf.mxu1 }
 0x19f   : > { %671 = vmax.xlane.f32.xlu0 %v596_v11  ;;  %v591_v14 = vadd.f32 %v912_v9, %v590_v12 }
 0x1a0   : > { %v1016_v13 = vpop.f32.mrf.mxu1 }
 0x1a1   : > { %v606_v15 = vadd.f32 %v1016_v13, %v912_v9 }
 0x1a2   : > { %v600_v16 = vpop.f32.mrf.mxu1 }
 0x1a3   : > { %675 = vmax.xlane.f32.xlu1 %v606_v15  ;;  %669 = vmax.xlane.f32.xlu0 %v591_v14  ;;  %v601_v18 = vadd.f32 %v912_v9, %v600_v16 }
 0x1a4   : > { %v1019_v17 = vpop.f32.mrf.mxu1 }
 0x1a5   : > { %v616_v22 = vadd.f32 %v1019_v17, %v912_v9 }
 0x1a6   : > { %v610_v19 = vpop.f32.mrf.mxu1 }
 0x1a7   : > { %v611_v20 = vadd.f32 %v912_v9, %v610_v19  ;;  %673 = vmax.xlane.f32.xlu1 %v601_v18 }
 0x1a8   : > { %v1022_v21 = vpop.f32.mrf.mxu1 }
 0x1a9   : > { %677 = vmax.xlane.f32.xlu0 %v611_v20  ;;  %v626_v26 = vadd.f32 %v1022_v21, %v912_v9 }
 0x1aa   : > { %v620_v23 = vpop.f32.mrf.mxu1 }
 0x1ab   : > { %v621_v24 = vadd.f32 %v912_v9, %v620_v23  ;;  %679 = vmax.xlane.f32.xlu1 %v616_v22 }
 0x1ac   : > { %v1025_v25 = vpop.f32.mrf.mxu1 }
 0x1ad   : > { %681 = vmax.xlane.f32.xlu0 %v621_v24  ;;  %v636_v30 = vadd.f32 %v1025_v25, %v912_v9 }
 0x1ae   : > { %v630_v27 = vpop.f32.mrf.mxu1 }
 0x1af   : > { %v631_v28 = vadd.f32 %v912_v9, %v630_v27  ;;  %683 = vmax.xlane.f32.xlu1 %v626_v26 }
 0x1b0   : > { %v1028_v29 = vpop.f32.mrf.mxu1 }
 0x1b1   : > { %685 = vmax.xlane.f32.xlu0 %v631_v28  ;;  %v1243_v34 = vadd.f32 %v1028_v29, %v912_v9 }
 0x1b2   : > { %v640_v31 = vpop.f32.mrf.mxu1 }
 0x1b3   : > { %v1241_v32 = vadd.f32 %v912_v9, %v640_v31  ;;  %687 = vmax.xlane.f32.xlu1 %v636_v30 }
 0x1b4   : > { %v1031_v33 = vpop.f32.mrf.mxu1 }
 0x1b5   : > { %689 = vmax.xlane.f32.xlu0 %v1241_v32  ;;  %v1249_v38 = vadd.f32 %v1031_v33, %v912_v9 }
 0x1b6   : > { %v650_v35 = vpop.f32.mrf.mxu1 }
 0x1b7   : > { %v1246_v36 = vadd.f32 %v912_v9, %v650_v35  ;;  %691 = vmax.xlane.f32.xlu1 %v1243_v34 }
 0x1b8   : > { %v1034_v37 = vpop.f32.mrf.mxu1 }
 0x1b9   : > { %693 = vmax.xlane.f32.xlu0 %v1246_v36  ;;  %v1255_v41 = vadd.f32 %v1034_v37, %v912_v9 }
 0x1ba   : > { %v660_v39 = vpop.f32.mrf.mxu1 }
 0x1bb   : > { %v1252_v40 = vadd.f32 %v912_v9, %v660_v39  ;;  %695 = vmax.xlane.f32.xlu1 %v1249_v38 }
 0x1bd   : > { %697 = vmax.xlane.f32.xlu0 %v1252_v40 }
 0x1bf   : > { %699 = vmax.xlane.f32.xlu1 %v1255_v41 }
 0x228   : > { %v672_v42 = vpop.xlane.xlu0 %671 }
 0x229   : > { %v702_v43 = vsub.f32 %v596_v11, %v672_v42 }
 0x22b   : > { %v719_v44 = vmul.f32 1.442695, %v702_v43 }
 0x22c   : > { %v676_v45 = vpop.xlane.xlu1 %675  ;;  %v670_v46 = vpop.xlane.xlu0 %669 }
 0x22d   : > { %1043 = vpow2.f32 %v719_v44  ;;  %v704_v47 = vsub.f32 %v606_v15, %v676_v45  ;;  %v701_v48 = vsub.f32 %v591_v14, %v670_v46 }
 0x22f   : > { %v723_v49 = vmul.f32 1.442695, %v704_v47  ;;  %v717_v50 = vmul.f32 1.442695, %v701_v48 }
 0x230   : > { %v674_v51 = vpop.xlane.xlu1 %673 }
 0x231   : > { %1045 = vpow2.f32 %v723_v49  ;;  %v703_v52 = vsub.f32 %v601_v18, %v674_v51 }
 0x232   : > { %1047 = vpow2.f32 %v717_v50  ;;  %v678_v53 = vpop.xlane.xlu0 %677 }
 0x233   : > { %v721_v54 = vmul.f32 1.442695, %v703_v52  ;;  %v705_v55 = vsub.f32 %v611_v20, %v678_v53 }
 0x234   : > { %v680_v56 = vpop.xlane.xlu1 %679 }
 0x235   : > { %1049 = vpow2.f32 %v721_v54  ;;  %v706_v57 = vsub.f32 %v616_v22, %v680_v56  ;;  %v725_v58 = vmul.f32 1.442695, %v705_v55 }
 0x236   : > { %v682_v59 = vpop.xlane.xlu0 %681 }
 0x237   : > { %v727_v60 = vmul.f32 1.442695, %v706_v57  ;;  %v707_v61 = vsub.f32 %v621_v24, %v682_v59 }
 0x238   : > { %v684_v62 = vpop.xlane.xlu1 %683 }
 0x239   : > { %1051 = vpow2.f32 %v727_v60  ;;  %v708_v63 = vsub.f32 %v626_v26, %v684_v62  ;;  %v729_v1 = vmul.f32 1.442695, %v707_v61 }
 0x23a   : > { %v1259_v0 = vpop.eup %1043  ;;  %1053 = vpow2.f32 %v725_v58  ;;  %v686_v2 = vpop.xlane.xlu0 %685 }
 0x23b   : > { %v731_v3 = vmul.f32 1.442695, %v708_v63  ;;  %v709_v4 = vsub.f32 %v631_v28, %v686_v2  ;;  %751 = vadd.xlane.f32.xlu1 %v1259_v0 }
 0x23c   : > { %v688_v5 = vpop.xlane.xlu1 %687 }
 0x23d   : > { %1055 = vpow2.f32 %v731_v3  ;;  %v710_v6 = vsub.f32 %v636_v30, %v688_v5  ;;  %v733_v8 = vmul.f32 1.442695, %v709_v4 }
 0x23e   : > { %v1262_v7 = vpop.eup %1045  ;;  %1057 = vpow2.f32 %v729_v1  ;;  %v690_v9 = vpop.xlane.xlu0 %689 }
 0x23f   : > { %v1264_v10 = vpop.eup %1047  ;;  %v735_v11 = vmul.f32 1.442695, %v710_v6  ;;  %v711_v12 = vsub.f32 %v1241_v32, %v690_v9  ;;  %755 = vadd.xlane.f32.xlu1 %v1262_v7 }
 0x240   : > { %749 = vadd.xlane.f32.xlu0 %v1264_v10  ;;  %v692_v13 = vpop.xlane.xlu1 %691 }
 0x241   : > { %1059 = vpow2.f32 %v735_v11  ;;  %v712_v14 = vsub.f32 %v1243_v34, %v692_v13  ;;  %v737_v16 = vmul.f32 1.442695, %v711_v12 }
 0x242   : > { %v1270_v15 = vpop.eup %1049  ;;  %1061 = vpow2.f32 %v733_v8  ;;  %v694_v17 = vpop.xlane.xlu0 %693 }
 0x243   : > { %v739_v18 = vmul.f32 1.442695, %v712_v14  ;;  %v713_v19 = vsub.f32 %v1246_v36, %v694_v17 }
 0x244   : > { %753 = vadd.xlane.f32.xlu0 %v1270_v15  ;;  %v696_v20 = vpop.xlane.xlu1 %695 }
 0x245   : > { %1063 = vpow2.f32 %v739_v18  ;;  %v714_v21 = vsub.f32 %v1249_v38, %v696_v20  ;;  %v741_v23 = vmul.f32 1.442695, %v713_v19 }
 0x246   : > { %v1275_v22 = vpop.eup %1051  ;;  %1065 = vpow2.f32 %v737_v16  ;;  %v698_v24 = vpop.xlane.xlu0 %697 }
 0x247   : > { %v1277_v25 = vpop.eup %1053  ;;  %v743_v26 = vmul.f32 1.442695, %v714_v21  ;;  %v715_v27 = vsub.f32 %v1252_v40, %v698_v24  ;;  %759 = vadd.xlane.f32.xlu1 %v1275_v22 }
 0x248   : > { %757 = vadd.xlane.f32.xlu0 %v1277_v25  ;;  %v700_v28 = vpop.xlane.xlu1 %699 }
 0x249   : > { %1067 = vpow2.f32 %v743_v26  ;;  %v716_v29 = vsub.f32 %v1255_v41, %v700_v28  ;;  %v745_v31 = vmul.f32 1.442695, %v715_v27 }
 0x24a   : > { %v1283_v30 = vpop.eup %1055  ;;  %1069 = vpow2.f32 %v741_v23 }
 0x24b   : > { %v1285_v32 = vpop.eup %1057  ;;  %v747_v33 = vmul.f32 1.442695, %v716_v29  ;;  %763 = vadd.xlane.f32.xlu1 %v1283_v30 }
 0x24c   : > { %761 = vadd.xlane.f32.xlu0 %v1285_v32 }
 0x24d   : > { %1071 = vpow2.f32 %v747_v33 }
 0x24e   : > { %v1289_v34 = vpop.eup %1059  ;;  %1073 = vpow2.f32 %v745_v31 }
 0x24f   : > { %v1291_v35 = vpop.eup %1061  ;;  %767 = vadd.xlane.f32.xlu1 %v1289_v34 }
 0x250   : > { %765 = vadd.xlane.f32.xlu0 %v1291_v35 }
 0x252   : > { %v1295_v36 = vpop.eup %1063 }
 0x253   : > { %v1297_v37 = vpop.eup %1065  ;;  %771 = vadd.xlane.f32.xlu1 %v1295_v36 }
 0x254   : > { %769 = vadd.xlane.f32.xlu0 %v1297_v37 }
 0x256   : > { %v1301_v38 = vpop.eup %1067 }
 0x257   : > { %v1303_v39 = vpop.eup %1069  ;;  %775 = vadd.xlane.f32.xlu1 %v1301_v38 }
 0x258   : > { %773 = vadd.xlane.f32.xlu0 %v1303_v39 }
 0x25a   : > { %v1307_v40 = vpop.eup %1071 }
 0x25b   : > { %v1309_v41 = vpop.eup %1073  ;;  %779 = vadd.xlane.f32.xlu1 %v1307_v40 }
 0x25c   : > { %777 = vadd.xlane.f32.xlu0 %v1309_v41 }
 0x2c4   : > { %v752_v42 = vpop.xlane.xlu1 %751 }
 0x2c5   : > { %1075 = vrcp.f32 %v752_v42 }
 0x2c8   : > { %v756_v43 = vpop.xlane.xlu1 %755 }
 0x2c9   : > { %1077 = vrcp.f32 %v756_v43  ;;  %v750_v44 = vpop.xlane.xlu0 %749 }
 0x2ca   : > { %1079 = vrcp.f32 %v750_v44 }
 0x2cd   : > { %v754_v45 = vpop.xlane.xlu0 %753 }
 0x2ce   : > { %1081 = vrcp.f32 %v754_v45 }
 0x2d0   : > { %v760_v46 = vpop.xlane.xlu1 %759 }
 0x2d1   : > { %1083 = vrcp.f32 %v760_v46  ;;  %v758_v47 = vpop.xlane.xlu0 %757 }
 0x2d2   : > { %v1076_v48 = vpop.eup %1075  ;;  %1085 = vrcp.f32 %v758_v47 }
 0x2d3   : > { %v784_v49 = vmul.f32 %v1076_v48, %v1259_v0 }
 0x2d4   : > { %v764_v50 = vpop.xlane.xlu1 %763 }
 0x2d5   : > { %815 = vst.msk [vmem:[%s1318_s23 + $0x8] sm:$0xff] %vm813_vm1, %v784_v49  ;;  %1087 = vrcp.f32 %v764_v50  ;;  %v762_v51 = vpop.xlane.xlu0 %761 }
 0x2d6   : > { %v1078_v52 = vpop.eup %1077  ;;  %1089 = vrcp.f32 %v762_v51 }
 0x2d7   : > { %v1080_v53 = vpop.eup %1079  ;;  %v788_v54 = vmul.f32 %v1078_v52, %v1262_v7 }
 0x2d8   : > { %v782_v55 = vmul.f32 %v1080_v53, %v1264_v10  ;;  %v768_v56 = vpop.xlane.xlu1 %767 }
 0x2d9   : > { %817 = vst.msk [vmem:[%s1318_s23 + $0x18] sm:$0xff] %vm813_vm1, %v788_v54  ;;  %1091 = vrcp.f32 %v768_v56  ;;  %v766_v57 = vpop.xlane.xlu0 %765 }
 0x2da   : > { %814 = vst.msk [vmem:[%s1318_s23] sm:$0xff] %vm813_vm1, %v782_v55  ;;  %1093 = vrcp.f32 %v766_v57 }
 0x2db   : > { %v1082_v58 = vpop.eup %1081 }
 0x2dc   : > { %v786_v59 = vmul.f32 %v1082_v58, %v1270_v15  ;;  %v772_v60 = vpop.xlane.xlu1 %771 }
 0x2dd   : > { %1095 = vrcp.f32 %v772_v60  ;;  %v770_v61 = vpop.xlane.xlu0 %769 }
 0x2de   : > { %v1084_v62 = vpop.eup %1083  ;;  %816 = vst.msk [vmem:[%s1318_s23 + $0x10] sm:$0xff] %vm813_vm1, %v786_v59  ;;  %1097 = vrcp.f32 %v770_v61 }
 0x2df   : > { %v1086_v63 = vpop.eup %1085  ;;  %v792_v0 = vmul.f32 %v1084_v62, %v1275_v22 }
 0x2e0   : > { %v790_v1 = vmul.f32 %v1086_v63, %v1277_v25  ;;  %v776_v2 = vpop.xlane.xlu1 %775 }
 0x2e1   : > { %819 = vst.msk [vmem:[%s1318_s23 + $0x28] sm:$0xff] %vm813_vm1, %v792_v0  ;;  %1099 = vrcp.f32 %v776_v2  ;;  %v774_v3 = vpop.xlane.xlu0 %773 }
 0x2e2   : > { %v1088_v4 = vpop.eup %1087  ;;  %818 = vst.msk [vmem:[%s1318_s23 + $0x20] sm:$0xff] %vm813_vm1, %v790_v1  ;;  %1101 = vrcp.f32 %v774_v3 }
 0x2e3   : > { %v1090_v5 = vpop.eup %1089  ;;  %v796_v6 = vmul.f32 %v1088_v4, %v1283_v30 }
 0x2e4   : > { %v794_v7 = vmul.f32 %v1090_v5, %v1285_v32  ;;  %v780_v8 = vpop.xlane.xlu1 %779 }
 0x2e5   : > { %821 = vst.msk [vmem:[%s1318_s23 + $0x38] sm:$0xff] %vm813_vm1, %v796_v6  ;;  %1103 = vrcp.f32 %v780_v8  ;;  %v778_v9 = vpop.xlane.xlu0 %777 }
 0x2e6   : > { %v1092_v10 = vpop.eup %1091  ;;  %820 = vst.msk [vmem:[%s1318_s23 + $0x30] sm:$0xff] %vm813_vm1, %v794_v7  ;;  %1105 = vrcp.f32 %v778_v9 }
 0x2e7   : > { %v1094_v11 = vpop.eup %1093  ;;  %v800_v12 = vmul.f32 %v1092_v10, %v1289_v34 }
 0x2e8   : > { %v798_v13 = vmul.f32 %v1094_v11, %v1291_v35 }
 0x2e9   : > { %823 = vst.msk [vmem:[%s1318_s23 + $0x48] sm:$0xff] %vm813_vm1, %v800_v12 }
 0x2ea   : > { %v1096_v14 = vpop.eup %1095  ;;  %822 = vst.msk [vmem:[%s1318_s23 + $0x40] sm:$0xff] %vm813_vm1, %v798_v13 }
 0x2eb   : > { %v1098_v15 = vpop.eup %1097  ;;  %v804_v16 = vmul.f32 %v1096_v14, %v1295_v36 }
 0x2ec   : > { %v802_v17 = vmul.f32 %v1098_v15, %v1297_v37 }
 0x2ed   : > { %825 = vst.msk [vmem:[%s1318_s23 + $0x58] sm:$0xff] %vm813_vm1, %v804_v16 }
 0x2ee   : > { %v1100_v18 = vpop.eup %1099  ;;  %824 = vst.msk [vmem:[%s1318_s23 + $0x50] sm:$0xff] %vm813_vm1, %v802_v17 }
 0x2ef   : > { %v1102_v19 = vpop.eup %1101  ;;  %v808_v20 = vmul.f32 %v1100_v18, %v1301_v38 }
 0x2f0   : > { %v806_v21 = vmul.f32 %v1102_v19, %v1303_v39 }
 0x2f1   : > { %827 = vst.msk [vmem:[%s1318_s23 + $0x68] sm:$0xff] %vm813_vm1, %v808_v20 }
 0x2f2   : > { %v1104_v22 = vpop.eup %1103  ;;  %826 = vst.msk [vmem:[%s1318_s23 + $0x60] sm:$0xff] %vm813_vm1, %v806_v21 }
 0x2f3   : > { %v1106_v23 = vpop.eup %1105  ;;  %v812_v24 = vmul.f32 %v1104_v22, %v1307_v40 }
 0x2f4   : > { %v810_v25 = vmul.f32 %v1106_v23, %v1309_v41 }
 0x2f5   : > { %829 = vst.msk [vmem:[%s1318_s23 + $0x78] sm:$0xff] %vm813_vm1, %v812_v24 }
 0x2f6   : > { %828 = vst.msk [vmem:[%s1318_s23 + $0x70] sm:$0xff] %vm813_vm1, %v810_v25 }
 0x2f7 PF: > { %s15_s18 = sadd.s32 1, %s1113_s18  }
 0x2f8   : > { %p12_p4 = scmp.ge.s32.totalorder %s15_s18, 4  }
 0x2fa   :  { %14 = sbr.rel (!%p12_p4) target bundleno = 1 (0x1), region = 70 }

</bundles_post_ra>
